<compile_context>
chip_gen: v5e
topology: v5e:2x2
jax: 0.10.0
libtpu: 0.0.40
codegen_flags: <defaults>
</compile_context>

<pallas_src>
import functools

import jax
import jax.numpy as jnp
from jax.experimental import pallas as pl
from jax.experimental.pallas import tpu as pltpu


# ----------------------------------------------------------------------------
# Pallas kernel: SumAggregatorWithDropout._call (eval mode) over a tile of rows.
# Rows live on lanes, D on sublanes, so VPU/XLU ops use full vregs for small D.
# ----------------------------------------------------------------------------
def _sum_aggregator_kernel(self_ref, neigh_ref, rel_ref, user_ref,
                           wt_ref, b_ref, o_ref, *, activation, approx_recip):
    u = user_ref[...].astype(jnp.float32)               # (D, rt)
    rel = rel_ref[...].astype(jnp.float32)              # (N, D, rt)
    neigh = neigh_ref[...].astype(jnp.float32)          # (N, D, rt)

    # Attention over the N sampled neighbors: softmax_N( mean_D(user * relation) ).
    logits = jnp.mean(rel * u[None, :, :], axis=1)      # (N, rt) sublane reduce
    m = jnp.max(logits, axis=0, keepdims=True)          # (1, rt)
    e = jnp.exp(logits - m)                             # (N, rt)
    denom = jnp.sum(e, axis=0, keepdims=True)           # (1, rt)
    if approx_recip:
        scores = e * pl.reciprocal(denom, approx=True)  # EUP slot, ~free
    else:
        scores = e / denom                              # exact (f32 parity path)

    # Attention-weighted neighbor MEAN (torch.mean(..., dim=2) in the module).
    agg = jnp.mean(scores[:, None, :] * neigh, axis=0)  # (D, rt)

    # TODO(synk): dropout on (self + agg) omitted — eval mode / p=0.0.
    h = self_ref[...].astype(jnp.float32) + agg         # (D, rt)

    # Dense layer, transposed: out^T = W^T @ x^T — a single MXU matmul per grid
    # step producing a lane-dense (D, rt) tile.
    out = jnp.dot(wt_ref[...], h.astype(wt_ref.dtype),
                  preferred_element_type=jnp.float32)   # (D, rt)
    out = out + b_ref[...]                              # (D, 1) bias column

    if activation == "relu":
        out = jnp.maximum(out, 0.0)
    elif activation == "tanh":
        out = jnp.tanh(out)
    # else: linear pass-through

    o_ref[...] = out.astype(o_ref.dtype)


def _round_up(x, m):
    return ((x + m - 1) // m) * m


def _choose_row_tile(n_rows, n_neighbors, dim, in_itemsize):
    """Pick (row_tile, padded_rows, vmem_limit_bytes).

    * row_tile is a multiple of 128 (full lane tiles); rows are padded up to a
      multiple of it (padded rows are computed and sliced off).
    * The VMEM budget counts double-buffered inputs AND the in-kernel f32
      temporaries, sized against the chip's physical VMEM (64 MiB/TC on v7x,
      128 MiB on v5e/v6e), with headroom left for Mosaic scratch.
    * The tile is capped so the grid has >= 2 steps whenever there are enough
      rows, letting dimension_semantics=("parallel",) use both v7x TensorCores.
    """
    try:
        vmem_cap = int(pltpu.get_tpu_info().vmem_capacity_bytes)
    except Exception:
        vmem_cap = 64 * 1024 * 1024
    vmem_limit = min(vmem_cap // 2, 64 * 1024 * 1024)
    budget = vmem_limit // 2            # headroom for Mosaic scratch / spills

    if n_rows <= 128:
        # A single lane-tile of rows: one grid step, no padding needed.
        return n_rows, n_rows, vmem_limit

    per_row = (
        2 * (2 * n_neighbors * dim + 2 * dim) * in_itemsize  # inputs, double-buffered
        + (3 * n_neighbors * dim + 8 * dim) * 4              # in-kernel f32 temporaries
        + 2 * dim * 4                                        # f32 output, double-buffered
    )
    cap = max(128, (budget // max(per_row, 1)) // 128 * 128)
    cap = min(cap, 1024)                # measured gains saturate ~512-1024 rows
    # Keep at least 2 grid steps (v7x megacore) once there is more than 1 tile.
    half = _round_up((n_rows + 1) // 2, 128)
    row_tile = min(cap, max(128, half))
    padded = _round_up(n_rows, row_tile)
    return row_tile, padded, vmem_limit


# ----------------------------------------------------------------------------
# Wrapper over row-flattened inputs (the form used by the full forward pass).
# ----------------------------------------------------------------------------
def sum_aggregator_rows(self_rows, neigh_rows, rel_rows, user_rows,
                        weight, bias, activation="relu",
                        in_dtype=jnp.bfloat16):
    """Pallas port of SumAggregatorWithDropout forward (eval mode).

    self_rows (R, D), neigh_rows/rel_rows (R, N, D), user_rows (R, D),
    weight (D, D) applied as x @ W, bias (D,).  Returns (R, D) float32.

    Bandwidth-heavy inputs are carried in `in_dtype` (bf16 by default, the
    kernel is HBM-bound); all in-kernel math is f32.
    """
    R, D = self_rows.shape
    N = neigh_rows.shape[1]
    in_dtype = jnp.dtype(in_dtype)

    # XLA-side layout plumbing: rows -> lanes (minor axis), D -> sublanes.
    self_t = self_rows.astype(in_dtype).T                              # (D, R)
    user_t = user_rows.astype(in_dtype).T                              # (D, R)
    neigh_t = jnp.transpose(neigh_rows.astype(in_dtype), (1, 2, 0))    # (N, D, R)
    rel_t = jnp.transpose(rel_rows.astype(in_dtype), (1, 2, 0))        # (N, D, R)
    w_t = weight.astype(in_dtype).T                                    # W^T (D, D)
    b_col = bias.astype(jnp.float32).reshape(D, 1)                     # (D, 1)

    rt, r_pad, vmem_limit = _choose_row_tile(R, N, D, in_dtype.itemsize)
    if r_pad != R:
        pad = r_pad - R
        self_t = jnp.pad(self_t, ((0, 0), (0, pad)))
        user_t = jnp.pad(user_t, ((0, 0), (0, pad)))
        neigh_t = jnp.pad(neigh_t, ((0, 0), (0, 0), (0, pad)))
        rel_t = jnp.pad(rel_t, ((0, 0), (0, 0), (0, pad)))

    grid = (r_pad // rt,)
    kernel = functools.partial(_sum_aggregator_kernel,
                               activation=activation,
                               approx_recip=in_dtype.itemsize < 4)

    flops = 2 * r_pad * D * D + 6 * r_pad * N * D
    transcendentals = r_pad * N + (r_pad * D if activation == "tanh" else 0)
    bytes_accessed = (in_dtype.itemsize * (2 * r_pad * N * D + 2 * r_pad * D + D * D)
                      + 4 * (r_pad * D + D))

    out_t = pl.pallas_call(
        kernel,
        out_shape=jax.ShapeDtypeStruct((D, r_pad), jnp.float32),
        grid_spec=pltpu.PrefetchScalarGridSpec(
            num_scalar_prefetch=0,
            grid=grid,
            in_specs=[
                pl.BlockSpec((D, rt), lambda r: (0, r)),
                pl.BlockSpec((N, D, rt), lambda r: (0, 0, r)),
                pl.BlockSpec((N, D, rt), lambda r: (0, 0, r)),
                pl.BlockSpec((D, rt), lambda r: (0, r)),
                # TODO(synk): weight/bias are grid-invariant; pipeline_mode=
                # pl.Buffered(1) would save one extra VMEM copy for large D.
                pl.BlockSpec((D, D), lambda r: (0, 0)),
                pl.BlockSpec((D, 1), lambda r: (0, 0)),
            ],
            out_specs=pl.BlockSpec((D, rt), lambda r: (0, r)),
        ),
        compiler_params=pltpu.CompilerParams(
            dimension_semantics=("parallel",),
            vmem_limit_bytes=vmem_limit),
        cost_estimate=pl.CostEstimate(
            flops=int(flops),
            transcendentals=int(transcendentals),
            bytes_accessed=int(bytes_accessed)),
    )(self_t, neigh_t, rel_t, user_t, w_t, b_col)

    return out_t[:, :R].T                                              # (R, D) f32


def sum_aggregator(self_vectors, neighbor_vectors, neighbor_relations,
                   user_embeddings, weight, bias, activation="relu",
                   in_dtype=jnp.bfloat16):
    """Convenience wrapper matching the torch aggregator call signature:
    self (B, K, D), neigh/rel (B, K, N, D), user (B, D) -> (B, K, D)."""
    B, K, D = self_vectors.shape
    N = neighbor_vectors.shape[2]
    # TODO(synk): per-row user duplication (K copies of each user row) could be
    # removed with a 2-D (batch, row-tile) grid when K is large; kept simple here.
    user_rows = jnp.broadcast_to(
        user_embeddings[:, None, :], (B, K, D)).reshape(B * K, D)
    out_rows = sum_aggregator_rows(
        self_vectors.reshape(B * K, D),
        neighbor_vectors.reshape(B * K, N, D),
        neighbor_relations.reshape(B * K, N, D),
        user_rows, weight, bias, activation=activation, in_dtype=in_dtype)
    return out_rows.reshape(B, K, D)


# ----------------------------------------------------------------------------
# Pure-JAX references (mirror the torch module exactly, f32).
# ----------------------------------------------------------------------------
def reference_aggregator_rows(self_rows, neigh_rows, rel_rows, user_rows,
                              weight, bias, activation="relu"):
    scores = jax.nn.softmax(
        jnp.mean(user_rows[:, None, :] * rel_rows, axis=-1), axis=-1)   # (R, N)
    agg = jnp.mean(scores[..., None] * neigh_rows, axis=1)              # (R, D)
    out = jnp.dot(self_rows + agg, weight,
                  precision=jax.lax.Precision.HIGHEST) + bias.reshape(1, -1)
    if activation == "relu":
        return jnp.maximum(out, 0.0)
    if activation == "tanh":
        return jnp.tanh(out)
    return out


def reference_aggregator(self_vectors, neighbor_vectors, neighbor_relations,
                         user_embeddings, weight, bias, activation="relu"):
    B, K, D = self_vectors.shape
    N = neighbor_vectors.shape[2]
    user_rows = jnp.broadcast_to(
        user_embeddings[:, None, :], (B, K, D)).reshape(B * K, D)
    out = reference_aggregator_rows(
        self_vectors.reshape(B * K, D),
        neighbor_vectors.reshape(B * K, N, D),
        neighbor_relations.reshape(B * K, N, D),
        user_rows, weight, bias, activation=activation)
    return out.reshape(B, K, D)


# ----------------------------------------------------------------------------
# Full KGPLStudent forward (embedding/adjacency gathers + multi-hop loop in JAX,
# aggregation hot path in the Pallas kernel). All hops sharing the same (W, b)
# are concatenated into a single aggregator invocation.
# ----------------------------------------------------------------------------
def kgpl_student_forward(params, adj_entity, adj_relation,
                         user_indices, item_indices, n_iter, n_neighbors,
                         aggregator_rows_fn):
    B = user_indices.shape[0]
    D = params["user_emb"].shape[-1]

    u_emb = params["user_emb"][user_indices]                       # (B, D)
    # TODO(synk): dropout on u_emb omitted — eval mode / p=0.0.

    # get_neighbors(): multi-hop entity / relation index expansion.
    entities = [item_indices.reshape(B, 1)]
    relations = []
    for _ in range(n_iter):
        neigh_e = adj_entity[entities[-1]].reshape(B, -1)
        neigh_r = adj_relation[entities[-1]].reshape(B, -1)
        entities.append(neigh_e)
        relations.append(neigh_r)

    rel_vecs = [params["relation_emb"][r] for r in relations]
    x = [params["entity_emb"][e] for e in entities]

    for i in range(n_iter):
        act = "relu" if i < n_iter - 1 else "tanh"
        W = params["agg_w"][i]
        b = params["agg_b"][i]
        n_hops = n_iter - i

        # Stack the rows of every hop at this iteration (same W, b) and run ONE
        # pallas_call: fewer launches, bigger tiles, more grid steps to shard.
        self_l, neigh_l, rel_l, user_l, hop_k = [], [], [], [], []
        for hop in range(n_hops):
            K = x[hop].shape[1]
            hop_k.append(K)
            self_l.append(x[hop].reshape(B * K, D))
            neigh_l.append(x[hop + 1].reshape(B * K, n_neighbors, D))
            rel_l.append(rel_vecs[hop].reshape(B * K, n_neighbors, D))
            user_l.append(jnp.broadcast_to(
                u_emb[:, None, :], (B, K, D)).reshape(B * K, D))

        out_rows = aggregator_rows_fn(
            jnp.concatenate(self_l, axis=0),
            jnp.concatenate(neigh_l, axis=0),
            jnp.concatenate(rel_l, axis=0),
            jnp.concatenate(user_l, axis=0),
            W, b, activation=act)

        next_x, off = [], 0
        for hop in range(n_hops):
            K = hop_k[hop]
            next_x.append(out_rows[off:off + B * K].reshape(B, K, D))
            off += B * K
        x = next_x

    item_repr = x[0].reshape(B, D)
    return jnp.sum(u_emb * item_repr, axis=1)                      # (B,)


if __name__ == "__main__":
    # Small, deterministic KGPLStudent-style setup.
    B = 2          # batch size
    D = 32         # emb_dim
    N = 8          # neighbor_sample_size
    n_iter = 2     # model['n_iter']
    n_user, n_entity, n_relation = 12, 24, 6

    key = jax.random.PRNGKey(0)
    ks = jax.random.split(key, 7)
    bound = (6.0 / (D + D)) ** 0.5    # xavier-style init for the dense layers
    params = {
        "user_emb": jax.random.normal(ks[0], (n_user, D), jnp.float32),
        "entity_emb": jax.random.normal(ks[1], (n_entity, D), jnp.float32),
        "relation_emb": jax.random.normal(ks[2], (n_relation, D), jnp.float32),
        "agg_w": [jax.random.uniform(k, (D, D), jnp.float32, -bound, bound)
                  for k in jax.random.split(ks[3], n_iter)],
        "agg_b": [jnp.zeros((D,), jnp.float32) for _ in range(n_iter)],
    }
    adj_entity = jax.random.randint(ks[4], (n_entity, N), 0, n_entity,
                                    dtype=jnp.int32)
    adj_relation = jax.random.randint(ks[5], (n_entity, N), 0, n_relation,
                                      dtype=jnp.int32)

    user_indices = jnp.array([1, 7], dtype=jnp.int32)
    item_indices = jnp.array([3, 20], dtype=jnp.int32)

    # Full forward with the Pallas aggregator (bf16 input storage: the kernel
    # is HBM-bound, so halving bytes ~halves wall clock).
    pallas_agg = functools.partial(sum_aggregator_rows, in_dtype=jnp.bfloat16)
    scores = kgpl_student_forward(params, adj_entity, adj_relation,
                                  user_indices, item_indices, n_iter, N,
                                  aggregator_rows_fn=pallas_agg)
    scores = jax.block_until_ready(scores)

    # Pure-JAX f32 reference of the same forward.
    ref_scores = kgpl_student_forward(params, adj_entity, adj_relation,
                                      user_indices, item_indices, n_iter, N,
                                      aggregator_rows_fn=reference_aggregator_rows)
    ref_scores = jax.block_until_ready(ref_scores)

    assert scores.shape == (B,)
    # bf16 input storage => loosened tolerance (expected precision loss, not a bug).
    assert jnp.allclose(scores, ref_scores, atol=1e-1, rtol=5e-2), (scores, ref_scores)

    # Exact-math parity check with f32 inputs (ReLU path), tight tolerance.
    k1, k2, k3, k4 = jax.random.split(ks[6], 4)
    sv = jax.random.normal(k1, (B, 4, D), jnp.float32)
    nv = jax.random.normal(k2, (B, 4, N, D), jnp.float32)
    nr = jax.random.normal(k3, (B, 4, N, D), jnp.float32)
    ue = jax.random.normal(k4, (B, D), jnp.float32)
    got = sum_aggregator(sv, nv, nr, ue, params["agg_w"][0], params["agg_b"][0],
                         activation="relu", in_dtype=jnp.float32)
    got = jax.block_until_ready(got)
    want = reference_aggregator(sv, nv, nr, ue, params["agg_w"][0],
                                params["agg_b"][0], activation="relu")
    assert jnp.allclose(got, want, atol=1e-4, rtol=1e-4)

    print("KERNEL_OK")
</pallas_src>

<mosaic_0001>
module attributes {stable_mosaic.version = 11 : i64} {
  func.func @_sum_aggregator_kernel(%arg0: i32, %arg1: memref<32x18xbf16, #tpu.memory_space<vmem>>, %arg2: memref<8x32x18xbf16, #tpu.memory_space<vmem>>, %arg3: memref<8x32x18xbf16, #tpu.memory_space<vmem>>, %arg4: memref<32x18xbf16, #tpu.memory_space<vmem>>, %arg5: memref<32x32xbf16, #tpu.memory_space<vmem>>, %arg6: memref<32x1xf32, #tpu.memory_space<vmem>>, %arg7: memref<32x18xf32, #tpu.memory_space<vmem>>) attributes {dimension_semantics = [#tpu.dimension_semantics<parallel>], iteration_bounds = array<i64: 1>, scalar_prefetch = 0 : i64, scratch_operands = 0 : i64, tpu.core_type = #tpu.core_type<tc>, window_params = [{transform_indices = @transform_0, window_bounds = array<i64: 32, 18>}, {transform_indices = @transform_1, window_bounds = array<i64: 8, 32, 18>}, {transform_indices = @transform_2, window_bounds = array<i64: 8, 32, 18>}, {transform_indices = @transform_3, window_bounds = array<i64: 32, 18>}, {pipeline_mode = #tpu.pipeline_mode<synchronous>, transform_indices = @transform_4, window_bounds = array<i64: 32, 32>}, {pipeline_mode = #tpu.pipeline_mode<synchronous>, transform_indices = @transform_5, window_bounds = array<i64: 32, 1>}, {transform_indices = @transform_6, window_bounds = array<i64: 32, 18>}]} {
    %c0 = arith.constant 0 : index
    %c0_0 = arith.constant 0 : index
    %0 = vector.load %arg4[%c0, %c0_0] : memref<32x18xbf16, #tpu.memory_space<vmem>>, vector<32x18xbf16>
    %1 = arith.extf %0 : vector<32x18xbf16> to vector<32x18xf32>
    %c0_1 = arith.constant 0 : index
    %c0_2 = arith.constant 0 : index
    %c0_3 = arith.constant 0 : index
    %2 = vector.load %arg3[%c0_1, %c0_2, %c0_3] : memref<8x32x18xbf16, #tpu.memory_space<vmem>>, vector<8x32x18xbf16>
    %3 = arith.extf %2 : vector<8x32x18xbf16> to vector<8x32x18xf32>
    %c0_4 = arith.constant 0 : index
    %c0_5 = arith.constant 0 : index
    %c0_6 = arith.constant 0 : index
    %4 = vector.load %arg2[%c0_4, %c0_5, %c0_6] : memref<8x32x18xbf16, #tpu.memory_space<vmem>>, vector<8x32x18xbf16>
    %5 = arith.extf %4 : vector<8x32x18xbf16> to vector<8x32x18xf32>
    %6 = vector.shape_cast %1 : vector<32x18xf32> to vector<1x32x18xf32>
    %7 = vector.broadcast %6 : vector<1x32x18xf32> to vector<8x32x18xf32>
    %8 = arith.mulf %3, %7 : vector<8x32x18xf32>
    %cst = arith.constant dense<0.000000e+00> : vector<8x18xf32>
    %9 = vector.multi_reduction <add>, %8, %cst [1] : vector<8x32x18xf32> to vector<8x18xf32>
    %cst_7 = arith.constant 3.200000e+01 : f32
    %10 = vector.broadcast %cst_7 : f32 to vector<8x18xf32>
    %11 = arith.divf %9, %10 : vector<8x18xf32>
    %cst_8 = arith.constant dense<0xFF800000> : vector<18xf32>
    %12 = vector.multi_reduction <maximumf>, %11, %cst_8 [0] : vector<8x18xf32> to vector<18xf32>
    %13 = vector.shape_cast %12 : vector<18xf32> to vector<1x18xf32>
    %14 = vector.broadcast %13 : vector<1x18xf32> to vector<8x18xf32>
    %15 = arith.subf %11, %14 : vector<8x18xf32>
    %16 = math.exp %15 : vector<8x18xf32>
    %cst_9 = arith.constant dense<0.000000e+00> : vector<18xf32>
    %17 = vector.multi_reduction <add>, %16, %cst_9 [0] : vector<8x18xf32> to vector<18xf32>
    %18 = vector.shape_cast %17 : vector<18xf32> to vector<1x18xf32>
    %19 = tpu.reciprocal %18 {approx = true} : vector<1x18xf32> -> vector<1x18xf32>
    %20 = vector.broadcast %19 : vector<1x18xf32> to vector<8x18xf32>
    %21 = arith.mulf %16, %20 : vector<8x18xf32>
    %22 = vector.shape_cast %21 : vector<8x18xf32> to vector<8x1x18xf32>
    %23 = vector.broadcast %22 : vector<8x1x18xf32> to vector<8x32x18xf32>
    %24 = arith.mulf %23, %5 : vector<8x32x18xf32>
    %cst_10 = arith.constant dense<0.000000e+00> : vector<32x18xf32>
    %25 = vector.multi_reduction <add>, %24, %cst_10 [0] : vector<8x32x18xf32> to vector<32x18xf32>
    %cst_11 = arith.constant 8.000000e+00 : f32
    %26 = vector.broadcast %cst_11 : f32 to vector<32x18xf32>
    %27 = arith.divf %25, %26 : vector<32x18xf32>
    %c0_12 = arith.constant 0 : index
    %c0_13 = arith.constant 0 : index
    %28 = vector.load %arg1[%c0_12, %c0_13] : memref<32x18xbf16, #tpu.memory_space<vmem>>, vector<32x18xbf16>
    %29 = arith.extf %28 : vector<32x18xbf16> to vector<32x18xf32>
    %30 = arith.addf %29, %27 : vector<32x18xf32>
    %c0_14 = arith.constant 0 : index
    %c0_15 = arith.constant 0 : index
    %31 = vector.load %arg5[%c0_14, %c0_15] : memref<32x32xbf16, #tpu.memory_space<vmem>>, vector<32x32xbf16>
    %32 = arith.truncf %30 : vector<32x18xf32> to vector<32x18xbf16>
    %cst_16 = arith.constant dense<0.000000e+00> : vector<32x18xf32>
    %33 = tpu.matmul %31, %32, %cst_16 {dimension_numbers = #tpu.dot_dimension_numbers<[1], [0], [0], [1], [0, 0, 1, 1], [], []>} : vector<32x32xbf16>, vector<32x18xbf16>, vector<32x18xf32> -> vector<32x18xf32>
    %c0_17 = arith.constant 0 : index
    %c0_18 = arith.constant 0 : index
    %34 = vector.load %arg6[%c0_17, %c0_18] : memref<32x1xf32, #tpu.memory_space<vmem>>, vector<32x1xf32>
    %35 = vector.broadcast %34 : vector<32x1xf32> to vector<32x18xf32>
    %36 = arith.addf %33, %35 : vector<32x18xf32>
    %cst_19 = arith.constant 0.000000e+00 : f32
    %37 = vector.broadcast %cst_19 : f32 to vector<32x18xf32>
    %38 = arith.maximumf %36, %37 : vector<32x18xf32>
    %c0_20 = arith.constant 0 : index
    %c0_21 = arith.constant 0 : index
    %39 = vector.load %arg7[%c0_20, %c0_21] : memref<32x18xf32, #tpu.memory_space<vmem>>, vector<32x18xf32>
    tpu.vector_store %arg7[%c0_20, %c0_21], %38 {strides = array<i32>} : memref<32x18xf32, #tpu.memory_space<vmem>>, vector<32x18xf32>,
    return
  }
  func.func @transform_0(%arg0: i32) -> (i32, i32) {
    %c0_i32 = arith.constant 0 : i32
    %c0_i32_0 = arith.constant 0 : i32
    return %c0_i32, %arg0 : i32, i32
  }
  func.func @transform_1(%arg0: i32) -> (i32, i32, i32) {
    %c0_i32 = arith.constant 0 : i32
    %c0_i32_0 = arith.constant 0 : i32
    %c0_i32_1 = arith.constant 0 : i32
    return %c0_i32, %c0_i32_0, %arg0 : i32, i32, i32
  }
  func.func @transform_2(%arg0: i32) -> (i32, i32, i32) {
    %c0_i32 = arith.constant 0 : i32
    %c0_i32_0 = arith.constant 0 : i32
    %c0_i32_1 = arith.constant 0 : i32
    return %c0_i32, %c0_i32_0, %arg0 : i32, i32, i32
  }
  func.func @transform_3(%arg0: i32) -> (i32, i32) {
    %c0_i32 = arith.constant 0 : i32
    %c0_i32_0 = arith.constant 0 : i32
    return %c0_i32, %arg0 : i32, i32
  }
  func.func @transform_4(%arg0: i32) -> (i32, i32) {
    %c0_i32 = arith.constant 0 : i32
    %c0_i32_0 = arith.constant 0 : i32
    %c0_i32_1 = arith.constant 0 : i32
    return %c0_i32, %c0_i32_0 : i32, i32
  }
  func.func @transform_5(%arg0: i32) -> (i32, i32) {
    %c0_i32 = arith.constant 0 : i32
    %c0_i32_0 = arith.constant 0 : i32
    %c0_i32_1 = arith.constant 0 : i32
    return %c0_i32, %c0_i32_0 : i32, i32
  }
  func.func @transform_6(%arg0: i32) -> (i32, i32) {
    %c0_i32 = arith.constant 0 : i32
    %c0_i32_0 = arith.constant 0 : i32
    return %c0_i32, %arg0 : i32, i32
  }
}

</mosaic_0001>

<bundles_post_ra>
// kernel: tpu_custom_call.1
= control target key start
LH: loop header
LB: loop body
LE: loop exit
PB: predicated region body
PF: predicated region fallthrough
CT: control target
= control target key end

     0   :  { %vm192_vm0 = vcmask 146432   ;;  %vm360_vm2 = vcmask 1041409   ;;  %vm363_vm3 = vcmask 1042434   ;;  %vm366_vm4 = vcmask 1043459   ;;  %s1332_s3 = inlined_call_operand.vmem [shape: bf16[32,18], index: 3, kind: input, shape index: {}]   ;;  %s1333_s2 = inlined_call_operand.vmem [shape: bf16[8,32,18], index: 2, kind: input, shape index: {}]   ;;  %s1334_s1 = inlined_call_operand.vmem [shape: bf16[8,32,18], index: 1, kind: input, shape index: {}]   ;;  %s1335_s0 = inlined_call_operand.vmem [shape: bf16[32,18], index: 0, kind: input, shape index: {}]   ;;  %s1336_s5 = inlined_call_operand.vmem [shape: f32[32,1], index: 5, kind: input, shape index: {}]   ;;  %s1337_s4 = inlined_call_operand.vmem [shape: bf16[32,32], index: 4, kind: input, shape index: {}]   ;;  %s1338_s6 = inlined_call_operand.vmem [shape: f32[32,18], index: 6, kind: output, shape index: {}]  }
   0x1   :  { %v612_v0 = vld [vmem:[%s1332_s3] sm:$0xff]   ;;  %v755_v1 = vld [vmem:[%s1332_s3 + $0x8] sm:$0xff]   ;;  %v757_v4 = vld [vmem:[%s1333_s2 + $0x10] sm:$0xff]   ;;  %vm369_vm5 = vcmask 1044484   ;;  %vm372_vm6 = vcmask 1045509   ;;  %vm375_vm7 = vcmask 1046534  }
   0x2   :  { %v620_v2 = vld [vmem:[%s1333_s2] sm:$0xff]   ;;  %v756_v3 = vld [vmem:[%s1333_s2 + $0x8] sm:$0xff]   ;;  %v758_v5 = vld [vmem:[%s1333_s2 + $0x18] sm:$0xff]   ;;  %v872_v6 = vunpack.c.l.bf16 %v612_v0  ;;  %v874_v7 = vunpack.c.h.bf16 %v612_v0  ;;  %v876_v8 = vunpack.c.l.bf16 %v755_v1  ;;  %v884_v11 = vunpack.c.h.bf16 %v755_v1 }
   0x3   :  { %v759_v9 = vld [vmem:[%s1333_s2 + $0x20] sm:$0xff]   ;;  %v760_v10 = vld [vmem:[%s1333_s2 + $0x28] sm:$0xff]   ;;  %v621_v12 = vunpack.c.l.bf16 %v620_v2  ;;  %v622_v13 = vunpack.c.h.bf16 %v620_v2  ;;  %v625_v14 = vunpack.c.l.bf16 %v756_v3  ;;  %v761_v15 = vld [vmem:[%s1333_s2 + $0x30] sm:$0xff]   ;;  %v626_v17 = vunpack.c.h.bf16 %v756_v3 }
   0x4   :  { %v762_v16 = vld [vmem:[%s1333_s2 + $0x38] sm:$0xff]   ;;  %v629_v18 = vunpack.c.l.bf16 %v757_v4  ;;  %v630_v19 = vunpack.c.h.bf16 %v757_v4  ;;  %v633_v20 = vunpack.c.l.bf16 %v758_v5  ;;  %v763_v21 = vld [vmem:[%s1333_s2 + $0x40] sm:$0xff]   ;;  %v764_v22 = vld [vmem:[%s1333_s2 + $0x48] sm:$0xff]   ;;  %v634_v23 = vunpack.c.h.bf16 %v758_v5 }
   0x5   :  { %v637_v24 = vunpack.c.l.bf16 %v759_v9  ;;  %v638_v25 = vunpack.c.h.bf16 %v759_v9  ;;  %v641_v26 = vunpack.c.l.bf16 %v760_v10  ;;  %v765_v27 = vld [vmem:[%s1333_s2 + $0x50] sm:$0xff]   ;;  %v766_v28 = vld [vmem:[%s1333_s2 + $0x58] sm:$0xff]   ;;  %v642_v29 = vunpack.c.h.bf16 %v760_v10  ;;  %v907_v33 = vld [vmem:[%s1333_s2 + $0x60] sm:$0xff]  }
   0x6   :  { %v645_v30 = vunpack.c.l.bf16 %v761_v15  ;;  %v646_v31 = vunpack.c.h.bf16 %v761_v15  ;;  %v649_v32 = vunpack.c.l.bf16 %v762_v16  ;;  %v912_v34 = vld [vmem:[%s1333_s2 + $0x68] sm:$0xff]   ;;  %v650_v35 = vunpack.c.h.bf16 %v762_v16  ;;  %v917_v39 = vld [vmem:[%s1333_s2 + $0x70] sm:$0xff]  }
   0x7   :  { %v653_v36 = vunpack.c.l.bf16 %v763_v21  ;;  %v654_v37 = vunpack.c.h.bf16 %v763_v21  ;;  %v657_v38 = vunpack.c.l.bf16 %v764_v22  ;;  %v658_v40 = vunpack.c.h.bf16 %v764_v22 }
   0x8   :  { %v661_v41 = vunpack.c.l.bf16 %v765_v27  ;;  %v662_v42 = vunpack.c.h.bf16 %v765_v27  ;;  %v665_v43 = vunpack.c.l.bf16 %v766_v28  ;;  %v666_v44 = vunpack.c.h.bf16 %v766_v28 }
   0x9   :  { %v669_v45 = vunpack.c.l.bf16 %v907_v33  ;;  %v670_v46 = vunpack.c.h.bf16 %v907_v33  ;;  %v673_v47 = vunpack.c.l.bf16 %v912_v34  ;;  %v674_v48 = vunpack.c.h.bf16 %v912_v34 }
   0xa   :  { %v677_v49 = vunpack.c.l.bf16 %v917_v39  ;;  %v160_v50 = vmul.f32 %v621_v12, %v872_v6  ;;  %v161_v51 = vmul.f32 %v622_v13, %v874_v7  ;;  %v162_v52 = vmul.f32 %v625_v14, %v876_v8 }
   0xb   :  { %v163_v53 = vmul.f32 %v626_v17, %v884_v11  ;;  %v164_v54 = vmul.f32 %v629_v18, %v872_v6  ;;  %v165_v55 = vmul.f32 %v630_v19, %v874_v7  ;;  %v166_v56 = vmul.f32 %v633_v20, %v876_v8 }
   0xc   :  { %v167_v57 = vmul.f32 %v634_v23, %v884_v11  ;;  %v168_v58 = vmul.f32 %v637_v24, %v872_v6  ;;  %v169_v59 = vmul.f32 %v638_v25, %v874_v7  ;;  %v170_v60 = vmul.f32 %v641_v26, %v876_v8 }
   0xd   :  { %v171_v61 = vmul.f32 %v642_v29, %v884_v11  ;;  %v172_v62 = vmul.f32 %v645_v30, %v872_v6  ;;  %v173_v63 = vmul.f32 %v646_v31, %v874_v7  ;;  %v174_v0 = vmul.f32 %v649_v32, %v876_v8 }
   0xe   :  { %v175_v1 = vmul.f32 %v650_v35, %v884_v11  ;;  %v176_v2 = vmul.f32 %v653_v36, %v872_v6  ;;  %v177_v3 = vmul.f32 %v654_v37, %v874_v7  ;;  %v178_v4 = vmul.f32 %v657_v38, %v876_v8 }
   0xf   :  { %v179_v5 = vmul.f32 %v658_v40, %v884_v11  ;;  %v180_v9 = vmul.f32 %v661_v41, %v872_v6  ;;  %v181_v10 = vmul.f32 %v662_v42, %v874_v7  ;;  %v182_v12 = vmul.f32 %v665_v43, %v876_v8 }
  0x10   :  { %v183_v13 = vmul.f32 %v666_v44, %v884_v11  ;;  %v193_v14 = vsel %vm192_vm0, %v160_v50, 0.0  ;;  %v194_v15 = vsel %vm192_vm0, %v161_v51, 0.0  ;;  %v196_v17 = vsel %vm192_vm0, %v162_v52, 0.0  ;;  %v770_v50 = vld [vmem:[%s1333_s2 + $0x78] sm:$0xff]  }
  0x11   :  { %v195_v16 = vadd.f32 %v194_v15, %v193_v14  ;;  %v206_v18 = vsel %vm192_vm0, %v164_v54, 0.0  ;;  %v207_v19 = vsel %vm192_vm0, %v165_v55, 0.0  ;;  %v209_v21 = vsel %vm192_vm0, %v166_v56, 0.0 }
  0x12   :  { %v208_v20 = vadd.f32 %v207_v19, %v206_v18  ;;  %v219_v22 = vsel %vm192_vm0, %v168_v58, 0.0  ;;  %v220_v23 = vsel %vm192_vm0, %v169_v59, 0.0  ;;  %v184_v24 = vmul.f32 %v669_v45, %v872_v6 }
  0x13   :  { %v198_v25 = vsel %vm192_vm0, %v163_v53, 0.0  ;;  %v221_v26 = vadd.f32 %v220_v23, %v219_v22  ;;  %v222_v27 = vsel %vm192_vm0, %v170_v60, 0.0  ;;  %v197_v28 = vadd.f32 %v196_v17, %v195_v16 }
  0x14   :  { %v232_v29 = vsel %vm192_vm0, %v172_v62, 0.0  ;;  %v233_v30 = vsel %vm192_vm0, %v173_v63, 0.0  ;;  %v235_v31 = vsel %vm192_vm0, %v174_v0, 0.0  ;;  %v210_v32 = vadd.f32 %v209_v21, %v208_v20 }
  0x15   :  { %v211_v33 = vsel %vm192_vm0, %v167_v57, 0.0  ;;  %v223_v35 = vadd.f32 %v222_v27, %v221_v26  ;;  %v234_v36 = vadd.f32 %v233_v30, %v232_v29  ;;  %v224_v37 = vsel %vm192_vm0, %v171_v61, 0.0 }
  0x16   :  { %v245_v38 = vsel %vm192_vm0, %v176_v2, 0.0  ;;  %v246_v40 = vsel %vm192_vm0, %v177_v3, 0.0  ;;  %v248_v41 = vsel %vm192_vm0, %v178_v4, 0.0  ;;  %v185_v42 = vmul.f32 %v670_v46, %v874_v7 }
  0x17   :  { %v236_v43 = vadd.f32 %v235_v31, %v234_v36  ;;  %v237_v44 = vsel %vm192_vm0, %v175_v1, 0.0  ;;  %v247_v45 = vadd.f32 %v246_v40, %v245_v38  ;;  %v199_v51 = vadd.f32 %v198_v25, %v197_v28 }
  0x18   :  { %v250_v52 = vsel %vm192_vm0, %v179_v5, 0.0  ;;  %v258_v53 = vsel %vm192_vm0, %v180_v9, 0.0  ;;  %v259_v54 = vsel %vm192_vm0, %v181_v10, 0.0  ;;  %v678_v55 = vunpack.c.h.bf16 %v917_v39 }
  0x19   :  { %v212_v56 = vadd.f32 %v211_v33, %v210_v32  ;;  %v225_v57 = vadd.f32 %v224_v37, %v223_v35  ;;  %v249_v46 = vadd.f32 %v248_v41, %v247_v45  ;;  %v186_v58 = vmul.f32 %v673_v47, %v876_v8 }
  0x1a   :  { %v238_v59 = vadd.f32 %v237_v44, %v236_v43  ;;  %v260_v60 = vadd.f32 %v259_v54, %v258_v53  ;;  %v261_v61 = vsel %vm192_vm0, %v182_v12, 0.0  ;;  %v681_v62 = vunpack.c.l.bf16 %v770_v50 }
  0x1b   :  { %v187_v63 = vmul.f32 %v674_v48, %v884_v11  ;;  %v251_v0 = vadd.f32 %v250_v52, %v249_v46  ;;  %v263_v1 = vsel %vm192_vm0, %v183_v13, 0.0  ;;  %v200_v2 = vrot.slane %v199_v51, 4 }
  0x1c   :  { %v262_v3 = vadd.f32 %v261_v61, %v260_v60  ;;  %v271_v4 = vsel %vm192_vm0, %v184_v24, 0.0  ;;  %v272_v5 = vsel %vm192_vm0, %v185_v42, 0.0  ;;  %v682_v9 = vunpack.c.h.bf16 %v770_v50 }
  0x1d   :  { %v188_v47 = vmul.f32 %v677_v49, %v872_v6  ;;  %v213_v10 = vrot.slane %v212_v56, 4  ;;  %v226_v12 = vrot.slane %v225_v57, 4  ;;  %v239_v14 = vrot.slane %v238_v59, 4 }
  0x1e   :  { %v264_v15 = vadd.f32 %v263_v1, %v262_v3  ;;  %v273_v34 = vadd.f32 %v272_v5, %v271_v4  ;;  %v274_v48 = vsel %vm192_vm0, %v186_v58, 0.0  ;;  %v189_v13 = vmul.f32 %v678_v55, %v874_v7 }
  0x1f   :  { %v190_v16 = vmul.f32 %v681_v62, %v876_v8  ;;  %v252_v17 = vrot.slane %v251_v0, 4  ;;  %v201_v18 = vadd.f32 %v200_v2, %v199_v51  ;;  %v276_v21 = vsel %vm192_vm0, %v187_v63, 0.0 }
  0x20   :  { %v265_v19 = vrot.slane %v264_v15, 4  ;;  %v275_v20 = vadd.f32 %v274_v48, %v273_v34  ;;  %v191_v39 = vmul.f32 %v682_v9, %v884_v11  ;;  %v214_v6 = vadd.f32 %v213_v10, %v212_v56 }
  0x21   :  { %v227_v49 = vadd.f32 %v226_v12, %v225_v57  ;;  %v240_v22 = vadd.f32 %v239_v14, %v238_v59  ;;  %v284_v24 = vsel %vm192_vm0, %v188_v47, 0.0  ;;  %v253_v25 = vadd.f32 %v252_v17, %v251_v0 }
  0x22   :  { %v277_v23 = vadd.f32 %v276_v21, %v275_v20  ;;  %v266_v26 = vadd.f32 %v265_v19, %v264_v15  ;;  %v285_v7 = vsel %vm192_vm0, %v189_v13, 0.0  ;;  %v202_v27 = vrot.slane %v201_v18, 2 }
  0x23   :  { %v286_v28 = vadd.f32 %v285_v7, %v284_v24  ;;  %v287_v29 = vsel %vm192_vm0, %v190_v16, 0.0  ;;  %v215_v30 = vrot.slane %v214_v6, 2  ;;  %v228_v31 = vrot.slane %v227_v49, 2 }
  0x24   :  { %v278_v8 = vrot.slane %v277_v23, 4  ;;  %v289_v32 = vsel %vm192_vm0, %v191_v39, 0.0  ;;  %v241_v11 = vrot.slane %v240_v22, 2  ;;  %v816_v36 = vmov 32.0  }
  0x25   :  { %v288_v35 = vadd.f32 %v287_v29, %v286_v28  ;;  %794 = vrcp.f32 %v816_v36  ;;  %v254_v37 = vrot.slane %v253_v25, 2  ;;  %v267_v38 = vrot.slane %v266_v26, 2 }
  0x26   :  { %v279_v33 = vadd.f32 %v278_v8, %v277_v23  ;;  %v203_v42 = vadd.f32 %v202_v27, %v201_v18  ;;  %v216_v43 = vadd.f32 %v215_v30, %v214_v6  ;;  %v229_v44 = vadd.f32 %v228_v31, %v227_v49 }
  0x27   :  { %v290_v41 = vadd.f32 %v289_v32, %v288_v35  ;;  %v242_v45 = vadd.f32 %v241_v11, %v240_v22  ;;  %v255_v51 = vadd.f32 %v254_v37, %v253_v25  ;;  %v268_v52 = vadd.f32 %v267_v38, %v266_v26 }
  0x28   :  { %v280_v40 = vrot.slane %v279_v33, 2  ;;  %v204_v56 = vrot.slane %v203_v42, 1  ;;  %v217_v57 = vrot.slane %v216_v43, 1  ;;  %v230_v58 = vrot.slane %v229_v44, 1 }
  0x29   :  { %v291_v50 = vrot.slane %v290_v41, 4  ;;  %v243_v59 = vrot.slane %v242_v45, 1  ;;  %v256_v61 = vrot.slane %v255_v51, 1  ;;  %v269_v62 = vrot.slane %v268_v52, 1 }
  0x2a   :  { %v281_v53 = vadd.f32 %v280_v40, %v279_v33  ;;  %v205_v2 = vadd.f32 %v204_v56, %v203_v42  ;;  %v218_v3 = vadd.f32 %v217_v57, %v216_v43  ;;  %v231_v5 = vadd.f32 %v230_v58, %v229_v44 }
  0x2b   :  { %v795_v54 = vpop.eup %794  ;;  %v292_v55 = vadd.f32 %v291_v50, %v290_v41  ;;  %v244_v9 = vadd.f32 %v243_v59, %v242_v45  ;;  %v257_v10 = vadd.f32 %v256_v61, %v255_v51  ;;  %v270_v12 = vadd.f32 %v269_v62, %v268_v52 }
  0x2c   :  { %v298_v46 = vmul.f32 32.0, %v795_v54  ;;  %v282_v63 = vrot.slane %v281_v53, 1  ;;  %vm302_vm1 = vweird.f32 %v795_v54  ;;  %vm378_vm8 = vcmask 1047559  }
  0x2d   :  { %v293_v60 = vrot.slane %v292_v55, 2  ;;  %vm561_vm10 = vcmask 261120  }
  0x2e   :  { %v299_v0 = vsub.f32 1.0, %v298_v46  ;;  %v283_v14 = vadd.f32 %v282_v63, %v281_v53 }
  0x2f   :  { %v294_v1 = vadd.f32 %v293_v60, %v292_v55 }
  0x30   :  { %v300_v4 = vmul.f32 %v795_v54, %v299_v0 }
  0x31   :  { %v295_v47 = vrot.slane %v294_v1, 1 }
  0x32   :  { %v301_v15 = vadd.f32 %v795_v54, %v300_v4 }
  0x33   :  { %v296_v34 = vadd.f32 %v295_v47, %v294_v1 }
  0x34   :  { %v303_v48 = vsel %vm302_vm1, %v795_v54, %v301_v15 }
  0x35   :  { %v304_v13 = vmul.f32 %v303_v48, %v205_v2  ;;  %v305_v16 = vmul.f32 %v303_v48, %v218_v3  ;;  %v306_v17 = vmul.f32 %v303_v48, %v231_v5  ;;  %v307_v18 = vmul.f32 %v303_v48, %v244_v9 }
  0x36   :  { %v308_v19 = vmul.f32 %v303_v48, %v257_v10  ;;  %v309_v20 = vmul.f32 %v303_v48, %v270_v12  ;;  %v310_v21 = vmul.f32 %v303_v48, %v283_v14  ;;  %v311_v39 = vmul.f32 %v303_v48, %v296_v34 }
  0x37   :  { %v312_v6 = vsel %vm192_vm0, %v304_v13, -inf  ;;  %v313_v49 = vsel %vm192_vm0, %v305_v16, -inf  ;;  %v314_v22 = vsel %vm192_vm0, %v306_v17, -inf  ;;  %v315_v23 = vsel %vm192_vm0, %v307_v18, -inf }
  0x38   :  { %v316_v24 = vsel %vm192_vm0, %v308_v19, -inf  ;;  %v318_v25 = vsel %vm192_vm0, %v309_v20, -inf  ;;  %v320_v26 = vsel %vm192_vm0, %v310_v21, -inf  ;;  %v322_v7 = vsel %vm192_vm0, %v311_v39, -inf }
  0x39   :  { %v317_v27 = vmax.f32 %v312_v6, %v316_v24  ;;  %v319_v8 = vmax.f32 %v313_v49, %v318_v25  ;;  %v321_v28 = vmax.f32 %v314_v22, %v320_v26  ;;  %v323_v29 = vmax.f32 %v315_v23, %v322_v7  ;;  %v1047_v49 = vld [vmem:[%s1334_s1 + $0x28] sm:$0xff]   ;;  %v1052_v22 = vld [vmem:[%s1334_s1 + $0x38] sm:$0xff]  }
  0x3a   :  { %v817_v48 = vmov 8.0   ;;  %v1057_v23 = vld [vmem:[%s1334_s1 + $0x48] sm:$0xff]   ;;  %v1065_v7 = vld [vmem:[%s1334_s1 + $0x58] sm:$0xff]  }
  0x3b   :  { %v324_v30 = vmax.f32 %v317_v27, %v319_v8  ;;  %v325_v31 = vmax.f32 %v321_v28, %v323_v29  ;;  %v1070_v27 = vld [vmem:[%s1334_s1 + $0x68] sm:$0xff]   ;;  %v705_v28 = vunpack.c.l.bf16 %v1047_v49  ;;  %v706_v29 = vunpack.c.h.bf16 %v1047_v49 }
  0x3d   :  { %v326_v32 = vmax.f32 %v324_v30, %v325_v31  ;;  %v1078_v30 = vld [vmem:[%s1334_s1 + $0x78] sm:$0xff]  }
  0x3f   :  { %v327_v11 = vsub.f32 %v304_v13, %v326_v32  ;;  %v328_v33 = vsub.f32 %v305_v16, %v326_v32  ;;  %v329_v35 = vsub.f32 %v306_v17, %v326_v32  ;;  %v330_v36 = vsub.f32 %v307_v18, %v326_v32 }
  0x40   :  { %v331_v37 = vsub.f32 %v308_v19, %v326_v32  ;;  %v332_v38 = vsub.f32 %v309_v20, %v326_v32  ;;  %v333_v40 = vsub.f32 %v310_v21, %v326_v32  ;;  %v334_v44 = vsub.f32 %v311_v39, %v326_v32  ;;  %v1036_v20 = vld [vmem:[%s1334_s1 + $0x8] sm:$0xff]   ;;  %v1041_v21 = vld [vmem:[%s1334_s1 + $0x18] sm:$0xff]   ;;  %v1083_v32 = vld [vmem:[%s1334_s1] sm:$0xff]  }
  0x41   :  { %v335_v41 = vmul.f32 1.442695, %v327_v11  ;;  %v337_v42 = vmul.f32 1.442695, %v328_v33  ;;  %v339_v43 = vmul.f32 1.442695, %v329_v35  ;;  %v689_v24 = vunpack.c.l.bf16 %v1036_v20 }
  0x42   :  { %v341_v45 = vmul.f32 1.442695, %v330_v36  ;;  %v343_v50 = vmul.f32 1.442695, %v331_v37  ;;  %v345_v51 = vmul.f32 1.442695, %v332_v38  ;;  %v690_v25 = vunpack.c.h.bf16 %v1036_v20 }
  0x43   :  { %796 = vpow2.f32 %v335_v41  ;;  %v347_v52 = vmul.f32 1.442695, %v333_v40  ;;  %v349_v53 = vmul.f32 1.442695, %v334_v44  ;;  %v697_v26 = vunpack.c.l.bf16 %v1041_v21  ;;  %v1092_v37 = vld [vmem:[%s1334_s1 + $0x10] sm:$0xff]   ;;  %v1097_v38 = vld [vmem:[%s1334_s1 + $0x20] sm:$0xff]  }
  0x44   :  { %798 = vpow2.f32 %v337_v42  ;;  %v698_v8 = vunpack.c.h.bf16 %v1041_v21  ;;  %v713_v11 = vunpack.c.l.bf16 %v1052_v22  ;;  %v714_v33 = vunpack.c.h.bf16 %v1052_v22  ;;  %v1106_v44 = vld [vmem:[%s1334_s1 + $0x30] sm:$0xff]  }
  0x45   :  { %800 = vpow2.f32 %v339_v43  ;;  %v721_v35 = vunpack.c.l.bf16 %v1057_v23  ;;  %v722_v36 = vunpack.c.h.bf16 %v1057_v23  ;;  %v729_v40 = vunpack.c.l.bf16 %v1065_v7 }
  0x46   :  { %802 = vpow2.f32 %v341_v45  ;;  %v730_v41 = vunpack.c.h.bf16 %v1065_v7  ;;  %v737_v42 = vunpack.c.l.bf16 %v1070_v27  ;;  %v738_v43 = vunpack.c.h.bf16 %v1070_v27 }
  0x47   :  { %804 = vpow2.f32 %v343_v50  ;;  %v745_v45 = vunpack.c.l.bf16 %v1078_v30  ;;  %v746_v50 = vunpack.c.h.bf16 %v1078_v30 }
  0x48   :  { %806 = vpow2.f32 %v345_v51  ;;  %v685_v51 = vunpack.c.l.bf16 %v1083_v32 }
  0x49   :  { %v1006_v54 = vpop.eup %796  ;;  %808 = vpow2.f32 %v347_v52  ;;  %v686_v52 = vunpack.c.h.bf16 %v1083_v32 }
  0x4a   :  { %v1008_v55 = vpop.eup %798  ;;  %810 = vpow2.f32 %v349_v53  ;;  %v1115_v53 = vld [vmem:[%s1334_s1 + $0x40] sm:$0xff]  }
  0x4b   :  { %v1010_v56 = vpop.eup %800  ;;  %v359_v57 = vrot.slane %v1008_v55, 7  ;;  %812 = vrcp.f32 %v817_v48 }
  0x4c   :  { %v1013_v46 = vpop.eup %802  ;;  %v362_v58 = vrot.slane %v1010_v56, 6 }
  0x4d   :  { %v1016_v59 = vpop.eup %804  ;;  %v361_v60 = vsel %vm360_vm2, %v359_v57, %v1006_v54  ;;  %v365_v61 = vrot.slane %v1013_v46, 5  ;;  %v1120_v57 = vld [vmem:[%s1334_s1 + $0x50] sm:$0xff]  }
  0x4e   :  { %v1020_v62 = vpop.eup %806  ;;  %v364_v63 = vsel %vm363_vm3, %v362_v58, %v361_v60  ;;  %v368_v0 = vrot.slane %v1016_v59, 4 }
  0x4f   :  { %v1023_v1 = vpop.eup %808  ;;  %v367_v2 = vsel %vm366_vm4, %v365_v61, %v364_v63  ;;  %v371_v3 = vrot.slane %v1020_v62, 3  ;;  %v693_v61 = vunpack.c.l.bf16 %v1092_v37  ;;  %v694_v63 = vunpack.c.h.bf16 %v1092_v37 }
  0x50   :  { %v1026_v4 = vpop.eup %810  ;;  %v370_v5 = vsel %vm369_vm5, %v368_v0, %v367_v2  ;;  %v374_v9 = vrot.slane %v1023_v1, 2  ;;  %v701_v0 = vunpack.c.l.bf16 %v1097_v38 }
  0x51   :  { %v373_v47 = vsel %vm372_vm6, %v371_v3, %v370_v5  ;;  %v377_v10 = vrot.slane %v1026_v4, 1  ;;  %v1031_v18 = vpop.eup %812  ;;  %v702_v3 = vunpack.c.h.bf16 %v1097_v38  ;;  %v709_v5 = vunpack.c.l.bf16 %v1106_v44 }
  0x52   :  { %v376_v12 = vsel %vm375_vm7, %v374_v9, %v373_v47  ;;  %v499_v6 = vmul.f32 8.0, %v1031_v18  ;;  %v710_v9 = vunpack.c.h.bf16 %v1106_v44  ;;  %v717_v47 = vunpack.c.l.bf16 %v1115_v53 }
  0x53   :  { %v379_v14 = vsel %vm378_vm8, %v377_v10, %v376_v12  ;;  %v718_v10 = vunpack.c.h.bf16 %v1115_v53  ;;  %vm503_vm9 = vweird.f32 %v1031_v18 }
  0x54   :  { %v381_v15 = vsel %vm192_vm0, %v379_v14, 0.0  ;;  %v500_v31 = vsub.f32 1.0, %v499_v6 }
  0x55   :  { %v382_v34 = vrot.slane %v381_v15, 4 }
  0x56   :  { %v501_v60 = vmul.f32 %v1031_v18, %v500_v31 }
  0x57   :  { %v383_v13 = vadd.f32 %v382_v34, %v381_v15 }
  0x59   :  { %v384_v16 = vrot.slane %v383_v13, 2 }
  0x5b   :  { %v385_v17 = vadd.f32 %v384_v16, %v383_v13  ;;  %v1140_v16 = vld [vmem:[%s1334_s1 + $0x60] sm:$0xff]  }
  0x5d   :  { %v386_v19 = vrot.slane %v385_v17, 1 }
  0x5f   :  { %v387_v39 = vadd.f32 %v386_v19, %v385_v17 }
  0x61   :  { %814 = vrcp.f32 %v387_v39  ;;  %v502_v39 = vadd.f32 %v1031_v18, %v501_v60 }
  0x67   :  { %v815_v58 = vpop.eup %814 }
  0x68   :  { %v389_v2 = vperm.slane %v815_v58, 0  ;;  %v734_v58 = vunpack.c.h.bf16 %v1140_v16 }
  0x6a   :  { %v390_v15 = vmul.f32 %v1006_v54, %v389_v2  ;;  %v391_v34 = vmul.f32 %v1008_v55, %v389_v2  ;;  %v392_v48 = vmul.f32 %v1010_v56, %v389_v2  ;;  %v393_v13 = vmul.f32 %v1013_v46, %v389_v2  ;;  %v1149_v54 = vld [vmem:[%s1334_s1 + $0x70] sm:$0xff]  }
  0x6b   :  { %v394_v17 = vmul.f32 %v1016_v59, %v389_v2  ;;  %v395_v19 = vmul.f32 %v1020_v62, %v389_v2  ;;  %v396_v31 = vmul.f32 %v1023_v1, %v389_v2  ;;  %v397_v59 = vmul.f32 %v1026_v4, %v389_v2 }
  0x6c   :  { %v398_v55 = vperm.slane %v390_v15, 0  ;;  %v399_v56 = vperm.slane %v391_v34, 0  ;;  %v400_v46 = vperm.slane %v392_v48, 0  ;;  %v1151_v6 = vperm.slane %v393_v13, 0  ;;  %v1162_v15 = vld [vmem:[%s1335_s0 + $0x8] sm:$0xff]  }
  0x6d   :  { %v733_v62 = vunpack.c.l.bf16 %v1140_v16  ;;  %v1157_v60 = vperm.slane %v394_v17, 0  ;;  %v741_v34 = vunpack.c.l.bf16 %v1149_v54  ;;  %v1165_v48 = vperm.slane %v395_v19, 0 }
  0x6e   :  { %v408_v14 = vmul.f32 %v689_v24, %v398_v55  ;;  %v412_v12 = vmul.f32 %v697_v26, %v399_v56  ;;  %v416_v1 = vmul.f32 %v705_v28, %v400_v46  ;;  %v1170_v4 = vsel %vm503_vm9, %v1031_v18, %v502_v39 }
  0x6f   :  { %v742_v2 = vunpack.c.h.bf16 %v1149_v54  ;;  %v409_v24 = vmul.f32 %v690_v25, %v398_v55  ;;  %v413_v26 = vmul.f32 %v698_v8, %v399_v56  ;;  %v417_v13 = vmul.f32 %v706_v29, %v400_v46 }
  0x70   :  { %v420_v17 = vmul.f32 %v713_v11, %v1151_v6  ;;  %v1180_v19 = vperm.slane %v396_v31, 0  ;;  %v1182_v28 = vperm.slane %v397_v59, 0  ;;  %v421_v18 = vmul.f32 %v714_v33, %v1151_v6 }
  0x71   :  { %v753_v39 = vunpack.c.l.bf16 %v1162_v15  ;;  %v424_v20 = vmul.f32 %v721_v35, %v1157_v60  ;;  %v468_v21 = vsel %vm192_vm0, %v408_v14, 0.0  ;;  %v469_v49 = vsel %vm192_vm0, %v412_v12, 0.0 }
  0x72   :  { %v471_v25 = vsel %vm192_vm0, %v416_v1, 0.0  ;;  %v425_v8 = vmul.f32 %v722_v36, %v1157_v60  ;;  %v428_v22 = vmul.f32 %v729_v40, %v1165_v48  ;;  %v470_v29 = vadd.f32 %v469_v49, %v468_v21 }
  0x73   :  { %v754_v11 = vunpack.c.h.bf16 %v1162_v15  ;;  %v473_v33 = vsel %vm192_vm0, %v420_v17, 0.0  ;;  %v483_v35 = vsel %vm192_vm0, %v409_v24, 0.0  ;;  %v484_v14 = vsel %vm192_vm0, %v413_v26, 0.0 }
  0x74   :  { %v486_v12 = vsel %vm192_vm0, %v417_v13, 0.0  ;;  %v432_v23 = vmul.f32 %v737_v42, %v1180_v19  ;;  %v436_v36 = vmul.f32 %v745_v45, %v1182_v28  ;;  %v472_v40 = vadd.f32 %v471_v25, %v470_v29 }
  0x75   :  { %v485_v31 = vadd.f32 %v484_v14, %v483_v35  ;;  %v429_v59 = vmul.f32 %v730_v41, %v1165_v48  ;;  %v433_v1 = vmul.f32 %v738_v43, %v1180_v19  ;;  %v475_v24 = vsel %vm192_vm0, %v424_v20, 0.0 }
  0x76   :  { %v488_v26 = vsel %vm192_vm0, %v421_v18, 0.0  ;;  %v437_v42 = vmul.f32 %v746_v50, %v1182_v28  ;;  %v474_v13 = vadd.f32 %v473_v33, %v472_v40  ;;  %v477_v45 = vsel %vm192_vm0, %v428_v22, 0.0 }
  0x77   :  { %v487_v17 = vadd.f32 %v486_v12, %v485_v31  ;;  %v490_v21 = vsel %vm192_vm0, %v425_v8, 0.0  ;;  %v406_v7 = vmul.f32 %v685_v51, %v398_v55  ;;  %v410_v27 = vmul.f32 %v693_v61, %v399_v56 }
  0x78   :  { %v414_v41 = vmul.f32 %v701_v0, %v400_v46  ;;  %v476_v43 = vadd.f32 %v475_v24, %v474_v13  ;;  %v479_v18 = vsel %vm192_vm0, %v432_v23, 0.0  ;;  %v481_v30 = vsel %vm192_vm0, %v436_v36, 0.0 }
  0x79   :  { %v489_v50 = vadd.f32 %v488_v26, %v487_v17  ;;  %v492_v20 = vsel %vm192_vm0, %v429_v59, 0.0  ;;  %v494_v49 = vsel %vm192_vm0, %v433_v1, 0.0  ;;  %v407_v25 = vmul.f32 %v686_v52, %v398_v55 }
  0x7a   :  { %v418_v51 = vmul.f32 %v709_v5, %v1151_v6  ;;  %v478_v61 = vadd.f32 %v477_v45, %v476_v43  ;;  %v411_v0 = vmul.f32 %v694_v63, %v399_v56  ;;  %v415_v22 = vmul.f32 %v702_v3, %v400_v46 }
  0x7b   :  { %v491_v8 = vadd.f32 %v490_v21, %v489_v50  ;;  %v422_v29 = vmul.f32 %v717_v47, %v1157_v60  ;;  %v438_v33 = vsel %vm192_vm0, %v406_v7, 0.0  ;;  %v439_v32 = vsel %vm192_vm0, %v410_v27, 0.0 }
  0x7c   :  { %v441_v52 = vsel %vm192_vm0, %v414_v41, 0.0  ;;  %v480_v55 = vadd.f32 %v479_v18, %v478_v61  ;;  %v496_v35 = vsel %vm192_vm0, %v437_v42, 0.0  ;;  %v440_v14 = vadd.f32 %v439_v32, %v438_v33  ;;  %v609_v32 = vld [vmem:[%s1337_s4] sm:$0xff] }
  0x7d   :  { %v493_v5 = vadd.f32 %v492_v20, %v491_v8  ;;  %v419_v37 = vmul.f32 %v710_v9, %v1151_v6  ;;  %v423_v38 = vmul.f32 %v718_v10, %v1157_v60  ;;  %v1339_v63 = vunpack.c.l.bf16 %v1120_v57 }
  0x7e   :  { %v443_v47 = vsel %vm192_vm0, %v418_v51, 0.0  ;;  %v482_v56 = vadd.f32 %v481_v30, %v480_v55  ;;  %v442_v12 = vadd.f32 %v441_v52, %v440_v14  ;;  %v453_v23 = vsel %vm192_vm0, %v407_v25, 0.0  ;;  %v530_v25 = vld [vmem:[%s1336_s5 + $0x18] sm:$0xff]  ;;  %v528_v51 = vld [vmem:[%s1336_s5 + $0x8] sm:$0xff] }
  0x7f   :  { %v426_v3 = vmul.f32 %v1339_v63, %v1165_v48  ;;  %v495_v46 = vadd.f32 %v494_v49, %v493_v5  ;;  %v430_v44 = vmul.f32 %v733_v62, %v1180_v19  ;;  %v445_v9 = vsel %vm192_vm0, %v422_v29, 0.0  ;;  %v610_v52 = vld [vmem:[%s1337_s4 + $0x8] sm:$0xff] }
  0x80   :  { %v454_v53 = vsel %vm192_vm0, %v411_v0, 0.0  ;;  %v456_v10 = vsel %vm192_vm0, %v415_v22, 0.0  ;;  %v507_v60 = vmul.f32 %v1170_v4, %v482_v56  ;;  %v444_v36 = vadd.f32 %v443_v47, %v442_v12 }
  0x81   :  { %v497_v6 = vadd.f32 %v496_v35, %v495_v46  ;;  %v455_v40 = vadd.f32 %v454_v53, %v453_v23  ;;  %v1340_v31 = vunpack.c.h.bf16 %v1120_v57  ;;  %v434_v1 = vmul.f32 %v741_v34, %v1182_v28  ;;  %v529_v57 = vld [vmem:[%s1336_s5 + $0x10] sm:$0xff] }
  0x82   :  { %v447_v62 = vsel %vm192_vm0, %v426_v3, 0.0  ;;  %v458_v24 = vsel %vm192_vm0, %v419_v37, 0.0  ;;  %v519_v42 = vadd.f32 %v753_v39, %v507_v60  ;;  %v446_v13 = vadd.f32 %v445_v9, %v444_v36 }
  0x83   :  { %v427_v59 = vmul.f32 %v1340_v31, %v1165_v48  ;;  %v508_v26 = vmul.f32 %v1170_v4, %v497_v6  ;;  %v457_v45 = vadd.f32 %v456_v10, %v455_v40  ;;  %v527_v48 = vld [vmem:[%s1336_s5] sm:$0xff]  ;;  %v431_v34 = vmul.f32 %v734_v58, %v1180_v19 }
  0x84   :  { %v449_v17 = vsel %vm192_vm0, %v430_v44, 0.0  ;;  %v460_v21 = vsel %vm192_vm0, %v423_v38, 0.0  ;;  %v448_v7 = vadd.f32 %v447_v62, %v446_v13  ;;  %v818_v41 = vmov 0  }
  0x85   :  { %v520_v39 = vadd.f32 %v754_v11, %v508_v26  ;;  %v459_v27 = vadd.f32 %v458_v24, %v457_v45  ;;  %793 = vset.pattern.permute.xlu1 %v818_v41  ;;  %792 = vset.pattern.permute.xlu0 %v818_v41  ;;  %v435_v43 = vmul.f32 %v742_v2, %v1182_v28  ;;  %v451_v18 = vsel %vm192_vm0, %v434_v1, 0.0  ;;  %v748_v11 = vld [vmem:[%s1335_s0] sm:$0xff]  }
  0x86   :  { %v462_v16 = vsel %vm192_vm0, %v427_v59, 0.0  ;;  %543 = vperm.xlu1 %793, %v529_v57   ;;  %533 = vperm.xlu0 %792, %v527_v48   ;;  %v450_v19 = vadd.f32 %v449_v17, %v448_v7  ;;  %v464_v15 = vsel %vm192_vm0, %v431_v34, 0.0  ;;  %v749_v49 = vunpack.c.l.bf16 %v748_v11 }
  0x87   :  { %v526_v58 = vpack.c.bf16 %v520_v39, %v519_v42  ;;  %v461_v30 = vadd.f32 %v460_v21, %v459_v27  ;;  %v466_v2 = vsel %vm192_vm0, %v435_v43, 0.0  ;;  %v750_v8 = vunpack.c.h.bf16 %v748_v11 }
  0x88   :  { %v452_v50 = vadd.f32 %v451_v18, %v450_v19 }
  0x89   :  { %574 = vmatpush.bf16.msra.mxu0 %v526_v58  ;;  %787 = vmatpush.bf16.msra.mxu1 %v526_v58  ;;  %v463_v54 = vadd.f32 %v462_v16, %v461_v30 }
  0x8a   :  { %v505_v20 = vmul.f32 %v1170_v4, %v452_v50 }
  0x8b   :  { %v465_v28 = vadd.f32 %v464_v15, %v463_v54 }
  0x8c   :  { %v517_v22 = vadd.f32 %v749_v49, %v505_v20 }
  0x8d   :  { %v467_v61 = vadd.f32 %v466_v2, %v465_v28 }
  0x8e   :  { %548 = vperm.xlu1 %793, %v530_v25   ;;  %538 = vperm.xlu0 %792, %v528_v51  }
  0x8f   :  { %v506_v0 = vmul.f32 %v1170_v4, %v467_v61 }
  0x91   :  { %v518_v29 = vadd.f32 %v750_v8, %v506_v0 }
  0x93   :  { %v525_v33 = vpack.c.bf16 %v518_v29, %v517_v22 }
  0x95   :  { %575 = vmatpush.bf16.msra.mxu0 %v525_v33  ;;  %788 = vmatpush.bf16.msra.mxu1 %v525_v33 }
  0x98   :  { %607 = vmatmul.msk.bf16.vlgmr.msra.gmra.mxu0 %vm561_vm10, %v609_v32  ;;  %608 = vmatmul.msk.bf16.vlgmr.msra.gmra.mxu1 %vm561_vm10, %v610_v52 }
  0xf8   :  { %v544_v55 = vpop.permute.xlu1 %543  ;;  %v534_v5 = vpop.permute.xlu0 %533 }
 0x100   :  { %v549_v3 = vpop.permute.xlu1 %548  ;;  %v539_v47 = vpop.permute.xlu0 %538 }
 0x115   :  { %v577_v35 = vpop.f32.mrf.mxu0  ;;  %v582_v4 = vpop.f32.mrf.mxu1 }
 0x116   :  { %v578_v14 = vadd.f32 %v577_v35, %v534_v5  ;;  %v583_v37 = vadd.f32 %v582_v4, %v544_v55 }
 0x118   :  { %v587_v38 = vmax.f32 %v578_v14, 0.0  ;;  %v589_v63 = vmax.f32 %v583_v37, 0.0 }
 0x11a   :  { %591 = vst.msk [vmem:[%s1338_s6] sm:$0xff] %vm192_vm0, %v587_v38 }
 0x11b   :  { %593 = vst.msk [vmem:[%s1338_s6 + $0x10] sm:$0xff] %vm192_vm0, %v589_v63 }
 0x11d   :  { %v579_v56 = vpop.f32.mrf.mxu0  ;;  %v584_v46 = vpop.f32.mrf.mxu1 }
 0x11e   :  { %v580_v12 = vadd.f32 %v579_v56, %v539_v47  ;;  %v585_v23 = vadd.f32 %v584_v46, %v549_v3 }
 0x120   :  { %v588_v44 = vmax.f32 %v580_v12, 0.0  ;;  %v590_v9 = vmax.f32 %v585_v23, 0.0 }
 0x122   :  { %592 = vst.msk [vmem:[%s1338_s6 + $0x8] sm:$0xff] %vm192_vm0, %v588_v44 }
 0x123   :  { %594 = vst.msk [vmem:[%s1338_s6 + $0x18] sm:$0xff] %vm192_vm0, %v590_v9 }

</bundles_post_ra>
